<compile_context>
chip_gen: v7x
topology: tpu7x:2x2x1
jax: 0.10.0
libtpu: 0.0.40
codegen_flags: <defaults>
</compile_context>

<pallas_src>
import jax
import jax.numpy as jnp
from jax.experimental import pallas as pl
from jax.experimental.pallas import tpu as pltpu

HIDDEN = 200  # fixed by the PyTorch module


# ----------------------------------------------------------------------------
# Kernel
# ----------------------------------------------------------------------------
def _ensemble_mlp_kernel(
    x_ref,
    w0_ref, b0_ref, w1_ref, b1_ref, w2_ref, b2_ref, w3_ref, b3_ref, w4_ref, b4_ref,
    maxlv_ref, minlv_ref,
    out_ref,
):
    """One (ensemble member, batch tile) step of the 5-layer swish MLP."""

    def hidden_layer(h, w_ref, b_ref):
        # bf16 operands, f32 MXU accumulation; cast once to bf16, then the bias
        # add and swish run packed bf16 (bf16 VPU/EUP on v6e/v7x).
        acc = jnp.dot(h, w_ref[...], preferred_element_type=jnp.float32)
        v = acc.astype(jnp.bfloat16) + b_ref[...]
        half_v = 0.5 * v
        # x * sigmoid(x) == 0.5*x*(1 + tanh(x/2)): single EUP transcendental.
        return half_v * (1.0 + jnp.tanh(half_v))

    h = hidden_layer(x_ref[...], w0_ref, b0_ref)
    h = hidden_layer(h, w1_ref, b1_ref)
    h = hidden_layer(h, w2_ref, b2_ref)
    h = hidden_layer(h, w3_ref, b3_ref)

    # Final affine layer stays in f32 (feeds softplus clamp + exp).
    out = jnp.dot(h, w4_ref[...], preferred_element_type=jnp.float32) + b4_ref[...]

    half = maxlv_ref.shape[-1]
    mean = out[:, :half]
    logvar = out[:, half:]

    max_lv = maxlv_ref[...]                              # (1, half) f32
    min_lv = minlv_ref[...]                              # (1, half) f32
    logvar = max_lv - jax.nn.softplus(max_lv - logvar)
    logvar = min_lv + jax.nn.softplus(logvar - min_lv)

    # Two direct slice stores -> no concatenate copy.
    out_ref[:, :half] = mean.astype(out_ref.dtype)
    out_ref[:, half:] = jnp.exp(logvar).astype(out_ref.dtype)


# ----------------------------------------------------------------------------
# Parameter prep (done once per parameter update, outside the hot path)
# ----------------------------------------------------------------------------
def prepare_params(params, compute_dtype=jnp.bfloat16):
    """Fold input normalization into lin0 and cast weights/hidden biases to bf16.

    (x - mu)/sigma @ w0 + b0  ==  x @ (w0/sigma) + (b0 - (mu/sigma) @ w0)
    The final-layer bias and the logvar clamps stay f32.
    """
    mu = params["inputs_mu"][0]                          # (Din,)
    sigma = params["inputs_sigma"][0]                    # (Din,)
    sigma = jnp.where(sigma < 1e-12, 1.0, sigma)         # fit_input_stats guard
    inv_sigma = 1.0 / sigma

    w0 = params["lin0_w"]                                # (E, Din, H) f32
    b0 = params["lin0_b"]                                # (E, 1, H)  f32
    w0_f = w0 * inv_sigma[None, :, None]
    b0_f = b0 - jnp.einsum("f,efo->eo", mu * inv_sigma, w0)[:, None, :]

    fused = {
        "lin0_w": w0_f.astype(compute_dtype),
        "lin0_b": b0_f.astype(compute_dtype),
        "max_logvar": params["max_logvar"].astype(jnp.float32),
        "min_logvar": params["min_logvar"].astype(jnp.float32),
    }
    for l in (1, 2, 3):
        fused[f"lin{l}_w"] = params[f"lin{l}_w"].astype(compute_dtype)
        fused[f"lin{l}_b"] = params[f"lin{l}_b"].astype(compute_dtype)
    fused["lin4_w"] = params["lin4_w"].astype(compute_dtype)
    fused["lin4_b"] = params["lin4_b"].astype(jnp.float32)
    return fused


# ----------------------------------------------------------------------------
# Wrapper
# ----------------------------------------------------------------------------
def ensemble_mlp_forward(x, fused_params, *, batch_tile=2048):
    """x: (E, B, Din); fused_params from prepare_params.

    Returns (mean, var), each (E, B, Dout // 2) f32.
    """
    E, B, Din = x.shape
    Dout = fused_params["lin4_w"].shape[-1]
    half = Dout // 2

    if B <= batch_tile:
        TB = B
    else:
        TB = (batch_tile // 8) * 8                       # keep sublane-aligned tiles
    n_b = pl.cdiv(B, TB)

    # Cast x once; halves its DMA bytes and removes the per-step cast.
    x = x.astype(jnp.bfloat16)

    # Grid is (E, B-tiles); B-tiles innermost so per-ensemble weights stay
    # VMEM-resident (block index constant across the inner axis -> no re-DMA).
    x_map = lambda e, b: (e, b, 0)        # tiled over batch
    w_map = lambda e, b: (e, 0, 0)        # per-ensemble, batch-invariant
    shared_map = lambda e, b: (0, 0)      # shared across the ensemble

    in_specs = [
        pl.BlockSpec((None, TB, Din), x_map),              # x (bf16)
        pl.BlockSpec((None, Din, HIDDEN), w_map),          # lin0_w (mu/sigma folded)
        pl.BlockSpec((None, 1, HIDDEN), w_map),            # lin0_b
        pl.BlockSpec((None, HIDDEN, HIDDEN), w_map),       # lin1_w
        pl.BlockSpec((None, 1, HIDDEN), w_map),            # lin1_b
        pl.BlockSpec((None, HIDDEN, HIDDEN), w_map),       # lin2_w
        pl.BlockSpec((None, 1, HIDDEN), w_map),            # lin2_b
        pl.BlockSpec((None, HIDDEN, HIDDEN), w_map),       # lin3_w
        pl.BlockSpec((None, 1, HIDDEN), w_map),            # lin3_b
        pl.BlockSpec((None, HIDDEN, Dout), w_map),         # lin4_w
        pl.BlockSpec((None, 1, Dout), w_map),              # lin4_b
        pl.BlockSpec((1, half), shared_map),               # max_logvar
        pl.BlockSpec((1, half), shared_map),               # min_logvar
    ]
    out_specs = pl.BlockSpec((None, TB, Dout), x_map)      # packed [mean | var]
    out_shape = jax.ShapeDtypeStruct((E, B, Dout), jnp.float32)

    packed = pl.pallas_call(
        _ensemble_mlp_kernel,
        grid=(E, n_b),
        in_specs=in_specs,
        out_specs=out_specs,
        out_shape=out_shape,
        compiler_params=pltpu.CompilerParams(
            # Both axes are fully independent -> lets v7x split either across
            # its two TensorCores (balanced even for small / odd E).
            dimension_semantics=("parallel", "parallel"),
            # Large batch tiles need more than v5e's 16 MiB scoped default;
            # 48 MiB is safe on every generation (v7x physical = 64 MiB).
            vmem_limit_bytes=48 * 1024 * 1024,
        ),
    )(
        x,
        fused_params["lin0_w"], fused_params["lin0_b"],
        fused_params["lin1_w"], fused_params["lin1_b"],
        fused_params["lin2_w"], fused_params["lin2_b"],
        fused_params["lin3_w"], fused_params["lin3_b"],
        fused_params["lin4_w"], fused_params["lin4_b"],
        fused_params["max_logvar"], fused_params["min_logvar"],
    )

    mean = packed[..., :half]
    var = packed[..., half:]
    return mean, var


# ----------------------------------------------------------------------------
# Synthetic params + pure-JAX f32 reference (PyTorch forward semantics)
# ----------------------------------------------------------------------------
def init_params(key, ensemble_size, in_features, out_features):
    def affine(k, e, i, o):
        kw, _ = jax.random.split(k)
        w = jax.random.normal(kw, (e, i, o), jnp.float32) / (2.0 * jnp.sqrt(i))
        b = jnp.zeros((e, 1, o), jnp.float32)
        return w, b

    keys = jax.random.split(key, 7)
    p = {}
    p["lin0_w"], p["lin0_b"] = affine(keys[0], ensemble_size, in_features, HIDDEN)
    p["lin1_w"], p["lin1_b"] = affine(keys[1], ensemble_size, HIDDEN, HIDDEN)
    p["lin2_w"], p["lin2_b"] = affine(keys[2], ensemble_size, HIDDEN, HIDDEN)
    p["lin3_w"], p["lin3_b"] = affine(keys[3], ensemble_size, HIDDEN, HIDDEN)
    p["lin4_w"], p["lin4_b"] = affine(keys[4], ensemble_size, HIDDEN, out_features)
    # Non-trivial post-fit_input_stats stats so the fold-into-lin0 path is exercised.
    p["inputs_mu"] = 0.1 * jax.random.normal(keys[5], (1, in_features), jnp.float32)
    p["inputs_sigma"] = 1.0 + 0.1 * jnp.abs(
        jax.random.normal(keys[6], (1, in_features), jnp.float32))
    p["max_logvar"] = jnp.ones((1, out_features // 2), jnp.float32) / 2.0
    p["min_logvar"] = -jnp.ones((1, out_features // 2), jnp.float32) * 10.0
    return p


def reference_forward(x, p):
    """Pure-JAX f32 reference of PtModel.forward (ret_logvar=True path + exp)."""
    def swish(v):
        return v * jax.nn.sigmoid(v)

    h = (x - p["inputs_mu"]) / p["inputs_sigma"]
    h = swish(jnp.einsum("ebi,eio->ebo", h, p["lin0_w"]) + p["lin0_b"])
    h = swish(jnp.einsum("ebi,eio->ebo", h, p["lin1_w"]) + p["lin1_b"])
    h = swish(jnp.einsum("ebi,eio->ebo", h, p["lin2_w"]) + p["lin2_b"])
    h = swish(jnp.einsum("ebi,eio->ebo", h, p["lin3_w"]) + p["lin3_b"])
    out = jnp.einsum("ebi,eio->ebo", h, p["lin4_w"]) + p["lin4_b"]
    half = out.shape[-1] // 2
    mean = out[:, :, :half]
    logvar = out[:, :, half:]
    logvar = p["max_logvar"] - jax.nn.softplus(p["max_logvar"] - logvar)
    logvar = p["min_logvar"] + jax.nn.softplus(logvar - p["min_logvar"])
    return mean, logvar


if __name__ == "__main__":
    ensemble_size, batch, in_features, out_features = 2, 8, 24, 8

    key = jax.random.PRNGKey(0)
    k_params, k_x = jax.random.split(key)
    params = init_params(k_params, ensemble_size, in_features, out_features)
    x = jax.random.normal(k_x, (ensemble_size, batch, in_features), jnp.float32)

    fused = prepare_params(params)                      # once per param update
    mean, var = jax.block_until_ready(ensemble_mlp_forward(x, fused))

    mean_ref, logvar_ref = reference_forward(x, params)
    # bf16 weights/activations (f32 accumulation) vs. the full-f32 reference.
    # Compare mean and logvar (not var) so exp() doesn't amplify bf16 noise.
    assert jnp.all(jnp.isfinite(mean)) and jnp.all(jnp.isfinite(var))
    assert jnp.allclose(mean, mean_ref, atol=5e-2, rtol=5e-2), "mean mismatch"
    assert jnp.allclose(jnp.log(var), logvar_ref, atol=5e-2, rtol=5e-2), "logvar mismatch"

    print("KERNEL_OK")
</pallas_src>

<mosaic_0001>
module attributes {stable_mosaic.version = 11 : i64} {
  func.func @_ensemble_mlp_kernel(%arg0: i32, %arg1: i32, %arg2: memref<1x8x24xbf16, #tpu.memory_space<vmem>>, %arg3: memref<1x24x200xbf16, #tpu.memory_space<vmem>>, %arg4: memref<1x1x200xbf16, #tpu.memory_space<vmem>>, %arg5: memref<1x200x200xbf16, #tpu.memory_space<vmem>>, %arg6: memref<1x1x200xbf16, #tpu.memory_space<vmem>>, %arg7: memref<1x200x200xbf16, #tpu.memory_space<vmem>>, %arg8: memref<1x1x200xbf16, #tpu.memory_space<vmem>>, %arg9: memref<1x200x200xbf16, #tpu.memory_space<vmem>>, %arg10: memref<1x1x200xbf16, #tpu.memory_space<vmem>>, %arg11: memref<1x200x8xbf16, #tpu.memory_space<vmem>>, %arg12: memref<1x1x8xf32, #tpu.memory_space<vmem>>, %arg13: memref<1x4xf32, #tpu.memory_space<vmem>>, %arg14: memref<1x4xf32, #tpu.memory_space<vmem>>, %arg15: memref<1x8x8xf32, #tpu.memory_space<vmem>>) attributes {dimension_semantics = [#tpu.dimension_semantics<parallel>, #tpu.dimension_semantics<parallel>], iteration_bounds = array<i64: 2, 1>, scalar_prefetch = 0 : i64, scratch_operands = 0 : i64, tpu.core_type = #tpu.core_type<tc>, window_params = [{transform_indices = @transform_0, window_bounds = array<i64: 1, 8, 24>}, {transform_indices = @transform_1, window_bounds = array<i64: 1, 24, 200>}, {transform_indices = @transform_2, window_bounds = array<i64: 1, 1, 200>}, {transform_indices = @transform_3, window_bounds = array<i64: 1, 200, 200>}, {transform_indices = @transform_4, window_bounds = array<i64: 1, 1, 200>}, {transform_indices = @transform_5, window_bounds = array<i64: 1, 200, 200>}, {transform_indices = @transform_6, window_bounds = array<i64: 1, 1, 200>}, {transform_indices = @transform_7, window_bounds = array<i64: 1, 200, 200>}, {transform_indices = @transform_8, window_bounds = array<i64: 1, 1, 200>}, {transform_indices = @transform_9, window_bounds = array<i64: 1, 200, 8>}, {transform_indices = @transform_10, window_bounds = array<i64: 1, 1, 8>}, {pipeline_mode = #tpu.pipeline_mode<synchronous>, transform_indices = @transform_11, window_bounds = array<i64: 1, 4>}, {pipeline_mode = #tpu.pipeline_mode<synchronous>, transform_indices = @transform_12, window_bounds = array<i64: 1, 4>}, {transform_indices = @transform_13, window_bounds = array<i64: 1, 8, 8>}]} {
    %c0 = arith.constant 0 : index
    %c0_0 = arith.constant 0 : index
    %c0_1 = arith.constant 0 : index
    %0 = vector.load %arg2[%c0, %c0_0, %c0_1] : memref<1x8x24xbf16, #tpu.memory_space<vmem>>, vector<1x8x24xbf16>
    %1 = vector.shape_cast %0 : vector<1x8x24xbf16> to vector<8x24xbf16>
    %c0_2 = arith.constant 0 : index
    %c0_3 = arith.constant 0 : index
    %c0_4 = arith.constant 0 : index
    %2 = vector.load %arg3[%c0_2, %c0_3, %c0_4] : memref<1x24x200xbf16, #tpu.memory_space<vmem>>, vector<1x24x200xbf16>
    %3 = vector.shape_cast %2 : vector<1x24x200xbf16> to vector<24x200xbf16>
    %cst = arith.constant dense<0.000000e+00> : vector<8x200xf32>
    %4 = tpu.matmul %1, %3, %cst {dimension_numbers = #tpu.dot_dimension_numbers<[1], [0], [0], [1], [0, 0, 1, 1], [], []>} : vector<8x24xbf16>, vector<24x200xbf16>, vector<8x200xf32> -> vector<8x200xf32>
    %5 = arith.truncf %4 : vector<8x200xf32> to vector<8x200xbf16>
    %c0_5 = arith.constant 0 : index
    %c0_6 = arith.constant 0 : index
    %c0_7 = arith.constant 0 : index
    %6 = vector.load %arg4[%c0_5, %c0_6, %c0_7] : memref<1x1x200xbf16, #tpu.memory_space<vmem>>, vector<1x1x200xbf16>
    %7 = vector.shape_cast %6 : vector<1x1x200xbf16> to vector<1x200xbf16>
    %8 = vector.broadcast %7 : vector<1x200xbf16> to vector<8x200xbf16>
    %9 = arith.addf %5, %8 : vector<8x200xbf16>
    %cst_8 = arith.constant 5.000000e-01 : bf16
    %10 = vector.broadcast %cst_8 : bf16 to vector<8x200xbf16>
    %11 = arith.mulf %10, %9 : vector<8x200xbf16>
    %12 = math.tanh %11 : vector<8x200xbf16>
    %cst_9 = arith.constant 1.000000e+00 : bf16
    %13 = vector.broadcast %cst_9 : bf16 to vector<8x200xbf16>
    %14 = arith.addf %13, %12 : vector<8x200xbf16>
    %15 = arith.mulf %11, %14 : vector<8x200xbf16>
    %c0_10 = arith.constant 0 : index
    %c0_11 = arith.constant 0 : index
    %c0_12 = arith.constant 0 : index
    %16 = vector.load %arg5[%c0_10, %c0_11, %c0_12] : memref<1x200x200xbf16, #tpu.memory_space<vmem>>, vector<1x200x200xbf16>
    %17 = vector.shape_cast %16 : vector<1x200x200xbf16> to vector<200x200xbf16>
    %cst_13 = arith.constant dense<0.000000e+00> : vector<8x200xf32>
    %18 = tpu.matmul %15, %17, %cst_13 {dimension_numbers = #tpu.dot_dimension_numbers<[1], [0], [0], [1], [0, 0, 1, 1], [], []>} : vector<8x200xbf16>, vector<200x200xbf16>, vector<8x200xf32> -> vector<8x200xf32>
    %19 = arith.truncf %18 : vector<8x200xf32> to vector<8x200xbf16>
    %c0_14 = arith.constant 0 : index
    %c0_15 = arith.constant 0 : index
    %c0_16 = arith.constant 0 : index
    %20 = vector.load %arg6[%c0_14, %c0_15, %c0_16] : memref<1x1x200xbf16, #tpu.memory_space<vmem>>, vector<1x1x200xbf16>
    %21 = vector.shape_cast %20 : vector<1x1x200xbf16> to vector<1x200xbf16>
    %22 = vector.broadcast %21 : vector<1x200xbf16> to vector<8x200xbf16>
    %23 = arith.addf %19, %22 : vector<8x200xbf16>
    %cst_17 = arith.constant 5.000000e-01 : bf16
    %24 = vector.broadcast %cst_17 : bf16 to vector<8x200xbf16>
    %25 = arith.mulf %24, %23 : vector<8x200xbf16>
    %26 = math.tanh %25 : vector<8x200xbf16>
    %cst_18 = arith.constant 1.000000e+00 : bf16
    %27 = vector.broadcast %cst_18 : bf16 to vector<8x200xbf16>
    %28 = arith.addf %27, %26 : vector<8x200xbf16>
    %29 = arith.mulf %25, %28 : vector<8x200xbf16>
    %c0_19 = arith.constant 0 : index
    %c0_20 = arith.constant 0 : index
    %c0_21 = arith.constant 0 : index
    %30 = vector.load %arg7[%c0_19, %c0_20, %c0_21] : memref<1x200x200xbf16, #tpu.memory_space<vmem>>, vector<1x200x200xbf16>
    %31 = vector.shape_cast %30 : vector<1x200x200xbf16> to vector<200x200xbf16>
    %cst_22 = arith.constant dense<0.000000e+00> : vector<8x200xf32>
    %32 = tpu.matmul %29, %31, %cst_22 {dimension_numbers = #tpu.dot_dimension_numbers<[1], [0], [0], [1], [0, 0, 1, 1], [], []>} : vector<8x200xbf16>, vector<200x200xbf16>, vector<8x200xf32> -> vector<8x200xf32>
    %33 = arith.truncf %32 : vector<8x200xf32> to vector<8x200xbf16>
    %c0_23 = arith.constant 0 : index
    %c0_24 = arith.constant 0 : index
    %c0_25 = arith.constant 0 : index
    %34 = vector.load %arg8[%c0_23, %c0_24, %c0_25] : memref<1x1x200xbf16, #tpu.memory_space<vmem>>, vector<1x1x200xbf16>
    %35 = vector.shape_cast %34 : vector<1x1x200xbf16> to vector<1x200xbf16>
    %36 = vector.broadcast %35 : vector<1x200xbf16> to vector<8x200xbf16>
    %37 = arith.addf %33, %36 : vector<8x200xbf16>
    %cst_26 = arith.constant 5.000000e-01 : bf16
    %38 = vector.broadcast %cst_26 : bf16 to vector<8x200xbf16>
    %39 = arith.mulf %38, %37 : vector<8x200xbf16>
    %40 = math.tanh %39 : vector<8x200xbf16>
    %cst_27 = arith.constant 1.000000e+00 : bf16
    %41 = vector.broadcast %cst_27 : bf16 to vector<8x200xbf16>
    %42 = arith.addf %41, %40 : vector<8x200xbf16>
    %43 = arith.mulf %39, %42 : vector<8x200xbf16>
    %c0_28 = arith.constant 0 : index
    %c0_29 = arith.constant 0 : index
    %c0_30 = arith.constant 0 : index
    %44 = vector.load %arg9[%c0_28, %c0_29, %c0_30] : memref<1x200x200xbf16, #tpu.memory_space<vmem>>, vector<1x200x200xbf16>
    %45 = vector.shape_cast %44 : vector<1x200x200xbf16> to vector<200x200xbf16>
    %cst_31 = arith.constant dense<0.000000e+00> : vector<8x200xf32>
    %46 = tpu.matmul %43, %45, %cst_31 {dimension_numbers = #tpu.dot_dimension_numbers<[1], [0], [0], [1], [0, 0, 1, 1], [], []>} : vector<8x200xbf16>, vector<200x200xbf16>, vector<8x200xf32> -> vector<8x200xf32>
    %47 = arith.truncf %46 : vector<8x200xf32> to vector<8x200xbf16>
    %c0_32 = arith.constant 0 : index
    %c0_33 = arith.constant 0 : index
    %c0_34 = arith.constant 0 : index
    %48 = vector.load %arg10[%c0_32, %c0_33, %c0_34] : memref<1x1x200xbf16, #tpu.memory_space<vmem>>, vector<1x1x200xbf16>
    %49 = vector.shape_cast %48 : vector<1x1x200xbf16> to vector<1x200xbf16>
    %50 = vector.broadcast %49 : vector<1x200xbf16> to vector<8x200xbf16>
    %51 = arith.addf %47, %50 : vector<8x200xbf16>
    %cst_35 = arith.constant 5.000000e-01 : bf16
    %52 = vector.broadcast %cst_35 : bf16 to vector<8x200xbf16>
    %53 = arith.mulf %52, %51 : vector<8x200xbf16>
    %54 = math.tanh %53 : vector<8x200xbf16>
    %cst_36 = arith.constant 1.000000e+00 : bf16
    %55 = vector.broadcast %cst_36 : bf16 to vector<8x200xbf16>
    %56 = arith.addf %55, %54 : vector<8x200xbf16>
    %57 = arith.mulf %53, %56 : vector<8x200xbf16>
    %c0_37 = arith.constant 0 : index
    %c0_38 = arith.constant 0 : index
    %c0_39 = arith.constant 0 : index
    %58 = vector.load %arg11[%c0_37, %c0_38, %c0_39] : memref<1x200x8xbf16, #tpu.memory_space<vmem>>, vector<1x200x8xbf16>
    %59 = vector.shape_cast %58 : vector<1x200x8xbf16> to vector<200x8xbf16>
    %cst_40 = arith.constant dense<0.000000e+00> : vector<8x8xf32>
    %60 = tpu.matmul %57, %59, %cst_40 {dimension_numbers = #tpu.dot_dimension_numbers<[1], [0], [0], [1], [0, 0, 1, 1], [], []>} : vector<8x200xbf16>, vector<200x8xbf16>, vector<8x8xf32> -> vector<8x8xf32>
    %c0_41 = arith.constant 0 : index
    %c0_42 = arith.constant 0 : index
    %c0_43 = arith.constant 0 : index
    %61 = vector.load %arg12[%c0_41, %c0_42, %c0_43] : memref<1x1x8xf32, #tpu.memory_space<vmem>>, vector<1x1x8xf32>
    %62 = vector.shape_cast %61 : vector<1x1x8xf32> to vector<1x8xf32>
    %63 = vector.broadcast %62 : vector<1x8xf32> to vector<8x8xf32>
    %64 = arith.addf %60, %63 : vector<8x8xf32>
    %65 = vector.extract_strided_slice %64 {offsets = [0, 0], sizes = [8, 4], strides = [1, 1]} : vector<8x8xf32> to vector<8x4xf32>
    %66 = vector.extract_strided_slice %64 {offsets = [0, 4], sizes = [8, 4], strides = [1, 1]} : vector<8x8xf32> to vector<8x4xf32>
    %c0_44 = arith.constant 0 : index
    %c0_45 = arith.constant 0 : index
    %67 = vector.load %arg13[%c0_44, %c0_45] : memref<1x4xf32, #tpu.memory_space<vmem>>, vector<1x4xf32>
    %c0_46 = arith.constant 0 : index
    %c0_47 = arith.constant 0 : index
    %68 = vector.load %arg14[%c0_46, %c0_47] : memref<1x4xf32, #tpu.memory_space<vmem>>, vector<1x4xf32>
    %69 = vector.broadcast %67 : vector<1x4xf32> to vector<8x4xf32>
    %70 = arith.subf %69, %66 : vector<8x4xf32>
    %cst_48 = arith.constant 0.000000e+00 : f32
    %71 = vector.broadcast %cst_48 : f32 to vector<8x4xf32>
    %72 = arith.maximumf %70, %71 : vector<8x4xf32>
    %73 = vector.broadcast %cst_48 : f32 to vector<8x4xf32>
    %74 = arith.subf %70, %73 : vector<8x4xf32>
    %75 = arith.cmpf one, %74, %74 : vector<8x4xf32>
    %76 = vector.broadcast %cst_48 : f32 to vector<8x4xf32>
    %77 = arith.addf %70, %76 : vector<8x4xf32>
    %78 = math.absf %74 : vector<8x4xf32>
    %cst_49 = arith.constant 0.000000e+00 : f32
    %79 = vector.broadcast %cst_49 : f32 to vector<8x4xf32>
    %80 = arith.subf %79, %78 : vector<8x4xf32>
    %81 = math.exp %80 : vector<8x4xf32>
    %82 = math.log1p %81 : vector<8x4xf32>
    %83 = arith.addf %72, %82 : vector<8x4xf32>
    %84 = arith.select %75, %77, %83 : vector<8x4xi1>, vector<8x4xf32>
    %85 = vector.broadcast %67 : vector<1x4xf32> to vector<8x4xf32>
    %86 = arith.subf %85, %84 : vector<8x4xf32>
    %87 = vector.broadcast %68 : vector<1x4xf32> to vector<8x4xf32>
    %88 = arith.subf %86, %87 : vector<8x4xf32>
    %cst_50 = arith.constant 0.000000e+00 : f32
    %89 = vector.broadcast %cst_50 : f32 to vector<8x4xf32>
    %90 = arith.maximumf %88, %89 : vector<8x4xf32>
    %91 = vector.broadcast %cst_50 : f32 to vector<8x4xf32>
    %92 = arith.subf %88, %91 : vector<8x4xf32>
    %93 = arith.cmpf one, %92, %92 : vector<8x4xf32>
    %94 = vector.broadcast %cst_50 : f32 to vector<8x4xf32>
    %95 = arith.addf %88, %94 : vector<8x4xf32>
    %96 = math.absf %92 : vector<8x4xf32>
    %cst_51 = arith.constant 0.000000e+00 : f32
    %97 = vector.broadcast %cst_51 : f32 to vector<8x4xf32>
    %98 = arith.subf %97, %96 : vector<8x4xf32>
    %99 = math.exp %98 : vector<8x4xf32>
    %100 = math.log1p %99 : vector<8x4xf32>
    %101 = arith.addf %90, %100 : vector<8x4xf32>
    %102 = arith.select %93, %95, %101 : vector<8x4xi1>, vector<8x4xf32>
    %103 = vector.broadcast %68 : vector<1x4xf32> to vector<8x4xf32>
    %104 = arith.addf %103, %102 : vector<8x4xf32>
    %c0_52 = arith.constant 0 : index
    %c0_53 = arith.constant 0 : index
    %c0_54 = arith.constant 0 : index
    %105 = vector.load %arg15[%c0_52, %c0_53, %c0_54] : memref<1x8x8xf32, #tpu.memory_space<vmem>>, vector<1x8x4xf32>
    %106 = vector.shape_cast %105 : vector<1x8x4xf32> to vector<8x4xf32>
    %107 = vector.shape_cast %65 : vector<8x4xf32> to vector<1x8x4xf32>
    tpu.vector_store %arg15[%c0_52, %c0_53, %c0_54], %107 {strides = array<i32>} : memref<1x8x8xf32, #tpu.memory_space<vmem>>, vector<1x8x4xf32>,
    %108 = math.exp %104 : vector<8x4xf32>
    %c0_55 = arith.constant 0 : index
    %c0_56 = arith.constant 0 : index
    %c4 = arith.constant 4 : index
    %109 = vector.load %arg15[%c0_55, %c0_56, %c4] : memref<1x8x8xf32, #tpu.memory_space<vmem>>, vector<1x8x4xf32>
    %110 = vector.shape_cast %109 : vector<1x8x4xf32> to vector<8x4xf32>
    %111 = vector.shape_cast %108 : vector<8x4xf32> to vector<1x8x4xf32>
    tpu.vector_store %arg15[%c0_55, %c0_56, %c4], %111 {strides = array<i32>} : memref<1x8x8xf32, #tpu.memory_space<vmem>>, vector<1x8x4xf32>,
    return
  }
  func.func @transform_0(%arg0: i32, %arg1: i32) -> (i32, i32, i32) {
    %c0_i32 = arith.constant 0 : i32
    %c0_i32_0 = arith.constant 0 : i32
    return %arg0, %arg1, %c0_i32 : i32, i32, i32
  }
  func.func @transform_1(%arg0: i32, %arg1: i32) -> (i32, i32, i32) {
    %c0_i32 = arith.constant 0 : i32
    %c0_i32_0 = arith.constant 0 : i32
    %c0_i32_1 = arith.constant 0 : i32
    return %arg0, %c0_i32, %c0_i32_0 : i32, i32, i32
  }
  func.func @transform_2(%arg0: i32, %arg1: i32) -> (i32, i32, i32) {
    %c0_i32 = arith.constant 0 : i32
    %c0_i32_0 = arith.constant 0 : i32
    %c0_i32_1 = arith.constant 0 : i32
    return %arg0, %c0_i32, %c0_i32_0 : i32, i32, i32
  }
  func.func @transform_3(%arg0: i32, %arg1: i32) -> (i32, i32, i32) {
    %c0_i32 = arith.constant 0 : i32
    %c0_i32_0 = arith.constant 0 : i32
    %c0_i32_1 = arith.constant 0 : i32
    return %arg0, %c0_i32, %c0_i32_0 : i32, i32, i32
  }
  func.func @transform_4(%arg0: i32, %arg1: i32) -> (i32, i32, i32) {
    %c0_i32 = arith.constant 0 : i32
    %c0_i32_0 = arith.constant 0 : i32
    %c0_i32_1 = arith.constant 0 : i32
    return %arg0, %c0_i32, %c0_i32_0 : i32, i32, i32
  }
  func.func @transform_5(%arg0: i32, %arg1: i32) -> (i32, i32, i32) {
    %c0_i32 = arith.constant 0 : i32
    %c0_i32_0 = arith.constant 0 : i32
    %c0_i32_1 = arith.constant 0 : i32
    return %arg0, %c0_i32, %c0_i32_0 : i32, i32, i32
  }
  func.func @transform_6(%arg0: i32, %arg1: i32) -> (i32, i32, i32) {
    %c0_i32 = arith.constant 0 : i32
    %c0_i32_0 = arith.constant 0 : i32
    %c0_i32_1 = arith.constant 0 : i32
    return %arg0, %c0_i32, %c0_i32_0 : i32, i32, i32
  }
  func.func @transform_7(%arg0: i32, %arg1: i32) -> (i32, i32, i32) {
    %c0_i32 = arith.constant 0 : i32
    %c0_i32_0 = arith.constant 0 : i32
    %c0_i32_1 = arith.constant 0 : i32
    return %arg0, %c0_i32, %c0_i32_0 : i32, i32, i32
  }
  func.func @transform_8(%arg0: i32, %arg1: i32) -> (i32, i32, i32) {
    %c0_i32 = arith.constant 0 : i32
    %c0_i32_0 = arith.constant 0 : i32
    %c0_i32_1 = arith.constant 0 : i32
    return %arg0, %c0_i32, %c0_i32_0 : i32, i32, i32
  }
  func.func @transform_9(%arg0: i32, %arg1: i32) -> (i32, i32, i32) {
    %c0_i32 = arith.constant 0 : i32
    %c0_i32_0 = arith.constant 0 : i32
    %c0_i32_1 = arith.constant 0 : i32
    return %arg0, %c0_i32, %c0_i32_0 : i32, i32, i32
  }
  func.func @transform_10(%arg0: i32, %arg1: i32) -> (i32, i32, i32) {
    %c0_i32 = arith.constant 0 : i32
    %c0_i32_0 = arith.constant 0 : i32
    %c0_i32_1 = arith.constant 0 : i32
    return %arg0, %c0_i32, %c0_i32_0 : i32, i32, i32
  }
  func.func @transform_11(%arg0: i32, %arg1: i32) -> (i32, i32) {
    %c0_i32 = arith.constant 0 : i32
    %c0_i32_0 = arith.constant 0 : i32
    %c0_i32_1 = arith.constant 0 : i32
    return %c0_i32, %c0_i32_0 : i32, i32
  }
  func.func @transform_12(%arg0: i32, %arg1: i32) -> (i32, i32) {
    %c0_i32 = arith.constant 0 : i32
    %c0_i32_0 = arith.constant 0 : i32
    %c0_i32_1 = arith.constant 0 : i32
    return %c0_i32, %c0_i32_0 : i32, i32
  }
  func.func @transform_13(%arg0: i32, %arg1: i32) -> (i32, i32, i32) {
    %c0_i32 = arith.constant 0 : i32
    %c0_i32_0 = arith.constant 0 : i32
    return %arg0, %arg1, %c0_i32 : i32, i32, i32
  }
}

</mosaic_0001>

<bundles_post_ra>
// kernel: tpu_custom_call.1
= control target key start
LH: loop header
LB: loop body
LE: loop exit
PB: predicated region body
PF: predicated region fallthrough
CT: control target
= control target key end

     0   :  { %s3138_s0 = inlined_call_operand.vmem [shape: bf16[2,8,24], index: 0, kind: input, shape index: {}]   ;;  %s3139_s1 = inlined_call_operand.vmem [shape: bf16[2,24,200], index: 1, kind: input, shape index: {}]   ;;  %s3140_s2 = inlined_call_operand.vmem [shape: bf16[2,1,200], index: 2, kind: input, shape index: {}]   ;;  %s3141_s3 = inlined_call_operand.hbm [shape: bf16[2,200,200], index: 3, kind: input, shape index: {}]   ;;  %s3142_s4 = inlined_call_operand.vmem [shape: bf16[2,1,200], index: 4, kind: input, shape index: {}]   ;;  %s3143_s5 = inlined_call_operand.hbm [shape: bf16[2,200,200], index: 5, kind: input, shape index: {}]   ;;  %s3144_s6 = inlined_call_operand.vmem [shape: bf16[2,1,200], index: 6, kind: input, shape index: {}]   ;;  %s3145_s7 = inlined_call_operand.hbm [shape: bf16[2,200,200], index: 7, kind: input, shape index: {}]   ;;  %s3146_s8 = inlined_call_operand.vmem [shape: bf16[2,1,200], index: 8, kind: input, shape index: {}]   ;;  %s3147_s9 = inlined_call_operand.vmem [shape: bf16[2,200,8], index: 9, kind: input, shape index: {}]   ;;  %s3148_s10 = inlined_call_operand.vmem [shape: f32[2,1,8], index: 10, kind: input, shape index: {}]   ;;  %s3149_s11 = inlined_call_operand.vmem [shape: f32[1,4], index: 11, kind: input, shape index: {}]   ;;  %s3150_s12 = inlined_call_operand.vmem [shape: f32[1,4], index: 12, kind: input, shape index: {}]   ;;  %s3151_s13 = inlined_call_operand.hbm [shape: f32[2,8,8], index: 13, kind: output, shape index: {}]  }
   0x1   :  { %3168 = sst [smem:[#allocation19_spill]] %s3143_s5 }
   0x2   :  { %3169 = sst [smem:[#allocation20_spill]] %s3144_s6 }
   0x3   :  { %3170 = sst [smem:[#allocation21_spill]] %s3146_s8 }
   0x4   :  { %3171 = sst [smem:[#allocation22_spill]] %s3148_s10 }
   0x5   :  { %3172 = sst [smem:[#allocation23_spill]] %s3149_s11 }
   0x6   :  { %3173 = sst [smem:[#allocation24_spill]] %s3150_s12 }
   0x7   :  { %3174 = sst [smem:[#allocation25_spill]] %s3151_s13 }
   0x8   :  { %18 = vsyncpa [#allocation3], 0 }
   0x9   :  { %20 = vsyncpa [#allocation3 + $0x1], 0 }
   0xa   :  { %21 = vsyncpa [#allocation6], 0 }
   0xb   :  { %23 = vsyncpa [#allocation6 + $0x1], 0 }
   0xc   :  { %24 = vsyncpa [#allocation4], 0 }
   0xd   :  { %26 = vsyncpa [#allocation4 + $0x1], 0  ;;  %s2663_s25 = smov 0   ;;  %s2665_s26 = smov 0  }
   0xe   :  { %s2667_s27 = smov 0   ;;  %s2669_s28 = smov 0  }
   0xf   :  { %s2671_s29 = smov 0   ;;  %s2673_s30 = smov 0  }
  0x10 LB: > { %3175 = sst [smem:[#allocation12_spill]] %s2561_s25  ;;  %s2694_s14 = sadd.s32 4294967295, %s2581_s30   ;;  %s2581_s30 = sphi %s2673_s30, %s32_s30   ;;  %s2577_s29 = sphi %s2671_s29, %s3212_s29   ;;  %s2573_s28 = sphi %s2669_s28, %s3211_s28   ;;  %s2569_s27 = sphi %s2667_s27, %s3215_s27   ;;  %s2565_s26 = sphi %s2665_s26, %s3214_s26   ;;  %s2561_s25 = sphi %s2663_s25, %s3213_s25  }
  0x11   : > { %3176 = sst [smem:[#allocation13_spill]] %s2577_s29  ;;  %s2030_s15 = sadd.s32 4294967294, %s2581_s30  }
  0x12   : > { %3177 = sst [smem:[#allocation14_spill]] %s2581_s30  ;;  %s44_s16 = sadd.s32 1, %s2577_s29 }
  0x13   : > { %s131_s17 = sadd.s32 1, %s2569_s27  ;;  %p46_p0 = scmp.ge.s32.totalorder %s44_s16, 2 }
  0x14   : > { %p138_p1 = scmp.ne.s32.totalorder %s2569_s27, %s2565_s26  ;;  %p139_p2 = scmp.eq.s32.totalorder %s2581_s30, 0 }
  0x15   : > { %p144_p3 = scmp.ne.s32.totalorder %s2565_s26, %s2561_s25  ;;  %s3217_s16 = smov (%p46_p0, %s44_s16), 0 }
  0x16   : > { %3178 = sst [smem:[#allocation15_spill]] %s3217_s16  ;;  %p2706_p4 = por %p139_p2, %p138_p1 }
  0x17   : > { %p145_p5 = scmp.eq.s32.totalorder %s2694_s14, 0  ;;  %s128_s19 = ssub.s32 %s2577_s29, %s3217_s16 }
  0x18   : > { %p394_p6 = scmp.eq.s32.totalorder %s2694_s14, 1  ;;  %p129_p7 = scmp.eq.s32.totalorder %s128_s19, 0 }
  0x19   : > { %p2714_p8 = por %p145_p5, %p144_p3  ;;  %p400_p10 = scmp.eq.s32.totalorder %s2030_s15, 1 }
  0x1a   : > { %p2718_p9 = por %p394_p6, %p138_p1  ;;  %p2191_p13 = scmp.lt.s32.totalorder %s2581_s30, 2 }
  0x1b   : > { %s3180_s20 = scalar_select %p2714_p8, 1, 0 }
  0x1c   : > { %s3181_s21 = scalar_select %p2718_p9, 1, 0 }
  0x1d   : > { %s2723_s22 = scalar_select %p129_p7, %s2569_s27, %s131_s17  }
  0x1e   : > { %3182 = sst [smem:[#allocation16_spill]] %s3181_s21  ;;  %p2725_p11 = por %p400_p10, %p144_p3 }
  0x1f   : > { %3183 = sst [smem:[#allocation17_spill]] %s2723_s22  ;;  %s3155_s24 = sand.u32 1, %s2569_s27  }
  0x20   : > { %s3184_s23 = scalar_select %p2725_p11, 1, 0 }
  0x21   : > { %s2734_s19 = smul.u32 200, %s3155_s24  ;;  %p2741_p0 = pnand %p2191_p13, %p2706_p4 }
  0x22   : > { %3185 = sst [smem:[#allocation18_spill]] %s3184_s23  ;;  %s2737_s16 = smul.u32 3200, %s2577_s29 }
  0x23   : > { %s479_s15 = sand.u32 1, %s2581_s30   ;;  %s3187_s5 = sld [smem:[#allocation19_spill]] }
  0x24   : > { %s483_s24 = scalar_lea.vmem [#allocation5], %s2734_s19  ;;  %s2757_s18 = scalar_lea.sflag [#allocation6], %s479_s15 }
  0x25   : > { %s490_s29 = sshll.u32 %s483_s24, 4  ;;  %p2763_p4 = pneg %p2741_p0  ;;  %s2754_s29 = int_to_ptr.vmem [resolvable:$true] %s490_s29 }
  0x29   : > { %s2750_s23 = scalar_lea.hbm %s3187_s5, %s2737_s16  ;;  %s2410_s24 = scalar_lea.hbm %s3187_s5, 6400 }
  0x2a   : > { %s2405_s13 = scalar_lea.hbm %s2750_s23, 3200  ;;  %p2411_p7 = scmp.lt.u32.totalorder %s2750_s23, %s3187_s5 }
  0x2b   : > { %p2406_p3 = scmp.ne.s32.totalorder %s2750_s23, %s2405_s13  ;;  %p2412_p10 = scmp.lt.u32.totalorder %s2410_s24, %s2405_s13 }
  0x2c   : > { %p2414_p12 = scmp.lt.u32.totalorder %s2405_s13, %s2750_s23 }
  0x2d   : > { %p2408_p5 = pnand %p2763_p4, %p2406_p3  ;;  %p2413_p13 = por %p2412_p10, %p2411_p7 }
  0x2f   : > { %p2409_p6 = pneg %p2408_p5  ;;  %p2415_p1 = por %p2414_p12, %p2413_p13 }
  0x31   : > { %p2416_p2 = pnand %p2415_p1, %p2409_p6 }
  0x33   : > { %2419 = shalt.err (!%p2416_p2)
}
  0x34   : > { %s2420_s15 = scalar_lea.vmem %s2754_s29, 3200  ;;  %s2583_s22 = smov [#allocation5]  }
  0x35   : > { %p2421_p3 = scmp.ne.s32.totalorder %s2754_s29, %s2420_s15  ;;  %s2425_s17 = sshll.u32 %s2583_s22, 4  ;;  %s2426_s17 = int_to_ptr.vmem [resolvable:$false] %s2425_s17 }
  0x36   : > { %s2427_s11 = scalar_lea.vmem %s2426_s17, 6400  ;;  %p2428_p9 = scmp.lt.s32.totalorder %s2754_s29, %s2426_s17 }
  0x37   : > { %p2423_p5 = pnand %p2421_p3, %p2763_p4  ;;  %p2429_p8 = scmp.lt.s32.totalorder %s2427_s11, %s2420_s15 }
  0x39   : > { %p2424_p11 = pneg %p2423_p5  ;;  %p2430_p7 = por %p2429_p8, %p2428_p9 }
  0x3b   : > { %p2431_p10 = pnand %p2430_p7, %p2424_p11 }
  0x3d   : > { %2434 = shalt.err (!%p2431_p10)
}
  0x3e   : > { %s3162_s12 = smov 128   ;;  %s3164_s13 = smov 8  }
  0x3f   : > { %2183 = dma.hbm_to_vmem [thread:$0]  (!%p2741_p0), %s2750_s23, 3200, %s2754_s29, %s2757_s18, %s3162_s12, %s3162_s12, %s3164_s13  }
  0x40   : > { %p3189_p8 = scmp.lt.s32.totalorder %s2581_s30, 3  ;;  %p3190_p9 = scmp.ge.s32.totalorder %s2581_s30, 1 }
  0x41   : > { %s2802_s17 = scalar_lea.hbm %s3141_s3, %s2737_s16  ;;  %s455_s11 = scalar_lea.vmem [#allocation2], %s2734_s19 }
  0x42   : > { %p2794_p11 = pnand %p3190_p9, %p3189_p8  ;;  %s462_s5 = sshll.u32 %s455_s11, 4  ;;  %s2805_s5 = int_to_ptr.vmem [resolvable:$true] %s462_s5 }
  0x43   : > { %s2811_s12 = scalar_lea.hbm %s3145_s7, %s2737_s16  ;;  %s3192_s13 = sand.u32 1, %s2569_s27  }
  0x44   : > { %s3191_s24 = scalar_select %p2794_p11, 1, 0 }
  0x45   : > { %s2815_s30 = scalar_lea.sflag [#allocation3], %s3192_s13  ;;  %s2435_s10 = scalar_lea.hbm %s2802_s17, 3200 }
  0x46   : > { %p2436_p12 = scmp.ne.s32.totalorder %s2802_s17, %s2435_s10  ;;  %s2440_s8 = scalar_lea.hbm %s3141_s3, 6400 }
  0x47   : > { %p2441_p6 = scmp.lt.u32.totalorder %s2802_s17, %s3141_s3  ;;  %p2442_p13 = scmp.lt.u32.totalorder %s2440_s8, %s2435_s10 }
  0x48   : > { %p2438_p1 = pnand %p2436_p12, %p2763_p4  ;;  %p2444_p5 = scmp.lt.u32.totalorder %s2435_s10, %s2802_s17 }
  0x49   : > { %p2443_p3 = por %p2442_p13, %p2441_p6 }
  0x4a   : > { %p2439_p2 = pneg %p2438_p1 }
  0x4b   : > { %p2445_p7 = por %p2444_p5, %p2443_p3 }
  0x4d   : > { %p2446_p10 = pnand %p2445_p7, %p2439_p2 }
  0x4f   : > { %2449 = shalt.err (!%p2446_p10)
}
  0x50   : > { %s2450_s16 = scalar_lea.vmem %s2805_s5, 3200  ;;  %s2586_s13 = smov [#allocation2]  }
  0x51   : > { %p2451_p8 = scmp.ne.s32.totalorder %s2805_s5, %s2450_s16  ;;  %s2455_s29 = sshll.u32 %s2586_s13, 4  ;;  %s2456_s29 = int_to_ptr.vmem [resolvable:$false] %s2455_s29 }
  0x52   : > { %s2457_s6 = scalar_lea.vmem %s2456_s29, 6400  ;;  %p2458_p1 = scmp.lt.s32.totalorder %s2805_s5, %s2456_s29 }
  0x53   : > { %p2453_p9 = pnand %p2451_p8, %p2763_p4  ;;  %p2459_p11 = scmp.lt.s32.totalorder %s2457_s6, %s2450_s16 }
  0x55   : > { %p2454_p12 = pneg %p2453_p9  ;;  %p2460_p6 = por %p2459_p11, %p2458_p1 }
  0x57   : > { %p2461_p13 = pnand %p2460_p6, %p2454_p12 }
  0x59   : > { %2464 = shalt.err (!%p2461_p13)
}
  0x5a   : > { %s3193_s8 = smov 8   ;;  %s3194_s10 = smov 128  }
  0x5b   : > { %2180 = dma.hbm_to_vmem [thread:$0]  (!%p2741_p0), %s2802_s17, 3200, %s2805_s5, %s2815_s30, %s3194_s10, %s3194_s10, %s3193_s8  }
  0x5c   : > { %s511_s23 = scalar_lea.vmem [#allocation7], %s2734_s19  ;;  %s2465_s22 = scalar_lea.hbm %s2811_s12, 3200 }
  0x5d   : > { %s518_s15 = sshll.u32 %s511_s23, 4  ;;  %p2466_p11 = scmp.ne.s32.totalorder %s2811_s12, %s2465_s22  ;;  %s2843_s15 = int_to_ptr.vmem [resolvable:$true] %s518_s15 }
  0x5e   : > { %s2470_s13 = scalar_lea.hbm %s3145_s7, 6400  ;;  %p2471_p5 = scmp.lt.u32.totalorder %s2811_s12, %s3145_s7 }
  0x5f   : > { %p2468_p2 = pnand %p2466_p11, %p2763_p4  ;;  %p2472_p7 = scmp.lt.u32.totalorder %s2470_s13, %s2465_s22 }
  0x60   : > { %p2474_p8 = scmp.lt.u32.totalorder %s2465_s22, %s2811_s12 }
  0x61   : > { %p2469_p3 = pneg %p2468_p2  ;;  %p2473_p10 = por %p2472_p7, %p2471_p5 }
  0x63   : > { %p2475_p9 = por %p2474_p8, %p2473_p10 }
  0x65   : > { %p2476_p12 = pnand %p2475_p9, %p2469_p3 }
  0x67   : > { %2479 = shalt.err (!%p2476_p12)
}
  0x68   : > { %s2480_s5 = scalar_lea.vmem %s2843_s15, 3200  ;;  %s2587_s30 = smov [#allocation7]  }
  0x69   : > { %p2481_p1 = scmp.ne.s32.totalorder %s2843_s15, %s2480_s5  ;;  %s2485_s19 = sshll.u32 %s2587_s30, 4  ;;  %s2486_s19 = int_to_ptr.vmem [resolvable:$false] %s2485_s19 }
  0x6a   : > { %s2487_s17 = scalar_lea.vmem %s2486_s19, 6400  ;;  %p2488_p11 = scmp.lt.s32.totalorder %s2843_s15, %s2486_s19 }
  0x6b   : > { %p2483_p6 = pnand %p2481_p1, %p2763_p4  ;;  %p2489_p2 = scmp.lt.s32.totalorder %s2487_s17, %s2480_s5 }
  0x6d   : > { %p2484_p13 = pneg %p2483_p6  ;;  %p2490_p5 = por %p2489_p2, %p2488_p11 }
  0x6f   : > { %p2491_p7 = pnand %p2490_p5, %p2484_p13 }
  0x71   : > { %2494 = shalt.err (!%p2491_p7)
}
  0x72   : > { %2186 = dma.hbm_to_vmem [thread:$0]  (!%p2741_p0), %s2811_s12, 3200, %s2843_s15, %s2757_s18, %s3194_s10, %s3194_s10, %s3193_s8  }
  0x73   : > { %p3195_p4 = scmp.ne.s32.totalorder %s3191_s24, 0 }
  0x74   : > { %s2873_s21 = sand.u32 (!%p3195_p4), 1, %s2565_s26   ;;  %p3196_p3 = scmp.ne.s32.totalorder (!%p3195_p4), %s3180_s20, 0 }
  0x75   : > { %551 = sbr.rel (%p3195_p4) target bundleno = 1639 (0x667), region = 72  ;;  %s554_s25 = scalar_lea.sflag (!%p3195_p4), [#allocation3], %s2873_s21 }
  0x76   : > { %s2876_s23 = smul.u32 (!%p3195_p4), 200, %s2873_s21 }
  0x78   : > { %s2880_s22 = scalar_lea.vmem (!%p3195_p4), [#allocation2], %s2876_s23 }
  0x7c   : > { %2548 = dma.done.wait (%p3196_p3), %s554_s25, 3200  }
  0x7d   : > { %2550 = vsyncadd (%p3196_p3), %s554_s25, 4294964096  ;;  %s562_s18 = sand.u32 1, %s2694_s14   ;;  %s2888_s24 = scalar_lea.vmem [#allocation5], %s2876_s23 }
  0x7e   : > { %s563_s12 = scalar_lea.sflag [#allocation6], %s562_s18 }
  0x7f   : > { %2552 = dma.done.wait (%p3196_p3), %s563_s12, 6400  }
  0x80   : > { %2554 = vsyncadd (%p3196_p3), %s563_s12, 4294960896  ;;  %p664_p0 = scmp.lt.s32.totalorder %s2573_s28, 1  ;;  %v2588_v0 = vmov 0   ;;  %vm726_vm0 = vcmask 1043456   ;;  %v2252_v6 = vld [vmem:[%s2880_s22 + $0x4] ss:$8 sps:$4 sm:$0xff]   ;;  %v789_v52 = vlaneseq }
  0x81   : > { %765 = vmatprep.mubr.bf16.mxu0 %v2588_v0  ;;  %v2254_v7 = vld [vmem:[%s2880_s22] ss:$8 sps:$4 sm:$0xff]   ;;  %984 = vmatprep.subr.bf16.mxu1 %v2252_v6  ;;  %v2255_v8 = vld [vmem:[%s2880_s22 + $0x14] ss:$8 sps:$4 sm:$0xff]   ;;  %v2257_v10 = vld [vmem:[%s2880_s22 + $0x10] ss:$8 sps:$4 sm:$0xff]  }
  0x82   : > { %s2897_s8 = scalar_select %p664_p0, %s2573_s28, 1  ;;  %985 = vmatpush1.bf16.msra.mxu1 %v2254_v7  ;;  %v2258_v11 = vld [vmem:[%s2880_s22 + $0x24] ss:$8 sps:$4 sm:$0xff]   ;;  %vm722_vm1 = vcmask 195584   ;;  %v2260_v13 = vld [vmem:[%s2880_s22 + $0x20] ss:$8 sps:$4 sm:$0xff]  }
  0x83   : > { %986 = vmatprep.subr.bf16.mxu1 %v2255_v8  ;;  %v2261_v14 = vld [vmem:[%s2880_s22 + $0x34] ss:$8 sps:$4 sm:$0xff]   ;;  %v2263_v15 = vld [vmem:[%s2880_s22 + $0x30] ss:$8 sps:$4 sm:$0xff]   ;;  %v2264_v16 = vld [vmem:[%s2880_s22 + $0x44] ss:$8 sps:$4 sm:$0xff]  }
  0x84   : > { %s2167_s14 = smul.u32 24, %s2897_s8  ;;  %s2038_s20 = sshll.u32 %s2897_s8, 2  ;;  %v2266_v17 = vld [vmem:[%s2880_s22 + $0x40] ss:$8 sps:$4 sm:$0xff]   ;;  %v2267_v18 = vld [vmem:[%s2880_s22 + $0x54] ss:$8 sps:$4 sm:$0xff]  }
  0x85   : > { %s670_s29 = scalar_lea.vmem %s3138_s0, %s2038_s20  ;;  %s2168_s6 = smul.u32 100, %s2897_s8  ;;  %v2269_v19 = vld [vmem:[%s2880_s22 + $0x50] ss:$8 sps:$4 sm:$0xff]   ;;  %v2270_v20 = vld [vmem:[%s2880_s22 + $0x64] ss:$8 sps:$4 sm:$0xff]   ;;  %v790_v54 = vshrl.u32 %v789_v52, 7 }
  0x86   : > { %s675_s11 = scalar_lea.vmem %s3139_s1, %s2167_s14  ;;  %v703_v12 = vld [vmem:[%s670_s29] sm:$0xf]  ;;  %987 = vmatpush1.bf16.msra.mxu1 %v2257_v10  ;;  %v2273_v22 = vld [vmem:[%s2880_s22 + $0x74] ss:$8 sps:$4 sm:$0xff]   ;;  %v2276_v24 = vld [vmem:[%s2880_s22 + $0x84] ss:$8 sps:$4 sm:$0xff]  }
  0x87   : > { %v706_v1 = vld [vmem:[%s675_s11 + $0x10] sm:$0xff]  ;;  %v2247_v2 = vld [vmem:[%s675_s11 + $0x4] ss:$8 sps:$4 sm:$0xff]   ;;  %v2250_v4 = vld [vmem:[%s675_s11] ss:$8 sps:$4 sm:$0xff]   ;;  %988 = vmatprep.subr.bf16.mxu1 %v2258_v11  ;;  %s2926_s19 = scalar_lea.vmem %s3147_s9, %s2168_s6  ;;  %s2957_s17 = sshll.u32 %s2897_s8, 1 }
  0x88   : > { %v2048_v3 = vcombine.high %v706_v1, %v706_v1  ;;  %v2047_v5 = vcombine.low %v706_v1, %v706_v1  ;;  %733 = vmatprep.subr.bf16.mxu0 %v2247_v2  ;;  %v2272_v21 = vld [vmem:[%s2880_s22 + $0x60] ss:$8 sps:$4 sm:$0xff]   ;;  %v2275_v23 = vld [vmem:[%s2880_s22 + $0x70] ss:$8 sps:$4 sm:$0xff]   ;;  %v2279_v26 = vld [vmem:[%s2880_s22 + $0x94] ss:$8 sps:$4 sm:$0xff]   ;;  %s679_s18 = scalar_lea.vmem %s3140_s2, %s2957_s17  ;;  %s683_s14 = scalar_lea.vmem %s3142_s4, %s2957_s17 }
  0x89   : > { %734 = vmatpush1.bf16.msra.mxu0 %v2250_v4  ;;  %v2278_v25 = vld [vmem:[%s2880_s22 + $0x80] ss:$8 sps:$4 sm:$0xff]   ;;  %v2281_v27 = vld [vmem:[%s2880_s22 + $0x90] ss:$8 sps:$4 sm:$0xff]   ;;  %v2282_v28 = vld [vmem:[%s2880_s22 + $0xa4] ss:$8 sps:$4 sm:$0xff]  }
  0x8a   : > { %2049 = vmatprep.subr.msk.bf16.mxu0 %vm726_vm0, %v2048_v3  ;;  %v728_v9 = vsel %vm726_vm0, %v2047_v5, 0  ;;  %989 = vmatpush1.bf16.msra.mxu1 %v2260_v13  ;;  %v2284_v29 = vld [vmem:[%s2880_s22 + $0xa0] ss:$8 sps:$4 sm:$0xff]   ;;  %v2285_v30 = vld [vmem:[%s2880_s22 + $0xb4] ss:$8 sps:$4 sm:$0xff]   ;;  %v2967_v61 = vsub.s32 0, %v790_v54 }
  0x8b   : > { %990 = vmatprep.subr.bf16.mxu1 %v2261_v14  ;;  %v848_v31 = vld [vmem:[%s2880_s22 + $0xc0] sm:$0xff]  ;;  %v2287_v32 = vld [vmem:[%s2880_s22 + $0xb0] ss:$8 sps:$4 sm:$0xff]   ;;  %v2292_v37 = vld [vmem:[%s2888_s24 + $0x4] ss:$8 sps:$4 sm:$0xff]   ;;  %vm974_vm2 = vcmask 588800  }
  0x8c   : > { %v2077_v33 = vcombine.high %v848_v31, %v848_v31  ;;  %v2076_v34 = vcombine.low %v848_v31, %v848_v31  ;;  %v2290_v36 = vld [vmem:[%s2888_s24] ss:$8 sps:$4 sm:$0xff]   ;;  %v2295_v38 = vld [vmem:[%s2888_s24 + $0x14] ss:$8 sps:$4 sm:$0xff]   ;;  %v2293_v39 = vld [vmem:[%s2888_s24 + $0x10] ss:$8 sps:$4 sm:$0xff]  }
  0x8d   : > { %736 = vmatpush1.bf16.msra.mxu0 %v728_v9  ;;  %v2298_v40 = vld [vmem:[%s2888_s24 + $0x24] ss:$8 sps:$4 sm:$0xff]   ;;  %v2296_v41 = vld [vmem:[%s2888_s24 + $0x20] ss:$8 sps:$4 sm:$0xff]   ;;  %v2301_v42 = vld [vmem:[%s2888_s24 + $0x34] ss:$8 sps:$4 sm:$0xff]  }
  0x8e   : > { %991 = vmatpush1.bf16.msra.mxu1 %v2263_v15  ;;  %v979_v35 = vsel %vm726_vm0, %v2076_v34, 0  ;;  %1234 = vmatprep.subr.bf16.mxu0 %v2292_v37  ;;  %v2299_v43 = vld [vmem:[%s2888_s24 + $0x30] ss:$8 sps:$4 sm:$0xff]   ;;  %v2304_v44 = vld [vmem:[%s2888_s24 + $0x44] ss:$8 sps:$4 sm:$0xff]   ;;  %s2987_s12 = scalar_lea.vmem [#allocation7], %s2876_s23 }
  0x8f   : > { %992 = vmatprep.subr.bf16.mxu1 %v2264_v16  ;;  %v2302_v45 = vld [vmem:[%s2888_s24 + $0x40] ss:$8 sps:$4 sm:$0xff]   ;;  %v2307_v46 = vld [vmem:[%s2888_s24 + $0x54] ss:$8 sps:$4 sm:$0xff]   ;;  %v2305_v47 = vld [vmem:[%s2888_s24 + $0x50] ss:$8 sps:$4 sm:$0xff]  }
  0x90   : > { %2050 = vmatmul.mubr.msk.bf16.vlgmr.msra.gmra.mrb[0].mxu0 %vm722_vm1, %v703_v12  ;;  %v2310_v48 = vld [vmem:[%s2888_s24 + $0x64] ss:$8 sps:$4 sm:$0xff]   ;;  %v2308_v49 = vld [vmem:[%s2888_s24 + $0x60] ss:$8 sps:$4 sm:$0xff]   ;;  %v2589_v50 = vmov 1966171168  }
  0x91   : > { %1235 = vmatpush1.bf16.msra.mxu0 %v2290_v36  ;;  %v787_v51 = vunpack.c.l.s4 %v2589_v50  ;;  %v2051_v55 = vld.sshfl [vmem:[%s679_s18] sm:$0x11 pattern:$0x75316420]  ;;  %v2333_v34 = vld [vmem:[%s2987_s12 + $0x14] ss:$8 sps:$4 sm:$0xff]  }
  0x92   : > { %993 = vmatpush1.bf16.msra.mxu1 %v2266_v17  ;;  %1236 = vmatprep.subr.bf16.mxu0 %v2295_v38  ;;  %v785_v57 = vcombine.high %v2051_v55, %v2051_v55  ;;  %v2336_v36 = vld [vmem:[%s2987_s12 + $0x24] ss:$8 sps:$4 sm:$0xff]   ;;  %v2334_v37 = vld [vmem:[%s2987_s12 + $0x20] ss:$8 sps:$4 sm:$0xff]   ;;  %v2339_v38 = vld [vmem:[%s2987_s12 + $0x34] ss:$8 sps:$4 sm:$0xff]  }
  0x93   : > { %994 = vmatprep.subr.bf16.mxu1 %v2267_v18  ;;  %v788_v53 = vunpack.c.0.s8 %v787_v51  ;;  %v2313_v18 = vld [vmem:[%s2888_s24 + $0x74] ss:$8 sps:$4 sm:$0xff]   ;;  %s3197_s11 = sld [smem:[#allocation20_spill]]  ;;  %s3198_s29 = sld [smem:[#allocation21_spill]]  ;;  %vm1786_vm3 = vcmask 31744   ;;  %vm1794_vm8 = vcmask 64544  }
  0x94   : > { %s2037_s25 = sshll.u32 %s2873_s21, 3  ;;  %s2590_s22 = smov 124  }
  0x95   : > { %1237 = vmatpush1.bf16.msra.mxu0 %v2293_v39  ;;  %v2963_v56 = vsub.s32 %v788_v53, %v790_v54  ;;  %v2337_v39 = vld [vmem:[%s2987_s12 + $0x30] ss:$8 sps:$4 sm:$0xff]   ;;  %s3074_s18 = scalar_lea.vmem [#allocation8], %s2037_s25  ;;  %s3201_s10 = sld [smem:[#allocation24_spill]] }
  0x96   : > { %995 = vmatpush1.bf16.msra.mxu1 %v2269_v19  ;;  %1238 = vmatprep.subr.bf16.mxu0 %v2298_v40  ;;  %v2311_v19 = vld [vmem:[%s2888_s24 + $0x70] ss:$8 sps:$4 sm:$0xff]   ;;  %v2342_v40 = vld [vmem:[%s2987_s12 + $0x44] ss:$8 sps:$4 sm:$0xff]   ;;  %s3202_s15 = sld [smem:[#allocation16_spill]]  ;;  %s1811_s16 = sshll.u32 %s3074_s18, 4  ;;  %s3090_s16 = int_to_ptr.vmem [resolvable:$true] %s1811_s16 }
  0x97   : > { %996 = vmatprep.subr.bf16.mxu1 %v2270_v20  ;;  %v792_v58 = vrot.slane %v2051_v55, %v2963_v56  ;;  %v799_v59 = vrot.slane %v785_v57, %v2963_v56  ;;  %v2316_v20 = vld [vmem:[%s2888_s24 + $0x84] ss:$8 sps:$4 sm:$0xff]   ;;  %s1797_s30 = scalar_lea.sflag [#allocation4], %s2873_s21 }
  0x99   : > { %1239 = vmatpush1.bf16.msra.mxu0 %v2296_v41  ;;  %v801_v60 = vpack.i.b16 %v792_v58, %v792_v58  ;;  %v808_v62 = vpack.i.b16 %v799_v59, %v799_v59  ;;  %v2340_v41 = vld [vmem:[%s2987_s12 + $0x40] ss:$8 sps:$4 sm:$0xff]   ;;  %s687_s20 = scalar_lea.vmem %s3197_s11, %s2957_s17  ;;  %s691_s6 = scalar_lea.vmem %s3198_s29, %s2957_s17 }
  0x9a   : > { %997 = vmatpush1.bf16.msra.mxu1 %v2272_v21  ;;  %1240 = vmatprep.subr.bf16.mxu0 %v2301_v42  ;;  %v2314_v21 = vld [vmem:[%s2888_s24 + $0x80] ss:$8 sps:$4 sm:$0xff]   ;;  %v2345_v42 = vld [vmem:[%s2987_s12 + $0x54] ss:$8 sps:$4 sm:$0xff]   ;;  %s2591_s11 = smov 4  }
  0x9b   : > { %998 = vmatprep.subr.bf16.mxu1 %v2273_v22  ;;  %v806_v63 = vrot.slane %v801_v60, %v2967_v61  ;;  %v813_v2 = vrot.slane %v808_v62, %v2967_v61  ;;  %v2319_v22 = vld [vmem:[%s2888_s24 + $0x94] ss:$8 sps:$4 sm:$0xff]  }
  0x9c   : > { %p3204_p8 = scmp.ne.s32.totalorder %s3202_s15, 0 }
  0x9d   : > { %1241 = vmatpush1.bf16.msra.mxu0 %v2299_v43  ;;  %v2343_v43 = vld [vmem:[%s2987_s12 + $0x50] ss:$8 sps:$4 sm:$0xff]  }
  0x9e   : > { %999 = vmatpush1.bf16.msra.mxu1 %v2275_v23  ;;  %1242 = vmatprep.subr.bf16.mxu0 %v2304_v44  ;;  %v2317_v23 = vld [vmem:[%s2888_s24 + $0x90] ss:$8 sps:$4 sm:$0xff]   ;;  %v2348_v44 = vld [vmem:[%s2987_s12 + $0x64] ss:$8 sps:$4 sm:$0xff]  }
  0x9f   : > { %1000 = vmatprep.subr.bf16.mxu1 %v2276_v24  ;;  %v2322_v24 = vld [vmem:[%s2888_s24 + $0xa4] ss:$8 sps:$4 sm:$0xff]  }
  0xa1   : > { %1243 = vmatpush1.bf16.msra.mxu0 %v2302_v45  ;;  %v2346_v45 = vld [vmem:[%s2987_s12 + $0x60] ss:$8 sps:$4 sm:$0xff]  }
  0xa2   : > { %1001 = vmatpush1.bf16.msra.mxu1 %v2278_v25  ;;  %1244 = vmatprep.subr.bf16.mxu0 %v2307_v46  ;;  %v2320_v25 = vld [vmem:[%s2888_s24 + $0xa0] ss:$8 sps:$4 sm:$0xff]  }
  0xa3   : > { %1002 = vmatprep.subr.bf16.mxu1 %v2279_v26  ;;  %v2325_v26 = vld [vmem:[%s2888_s24 + $0xb4] ss:$8 sps:$4 sm:$0xff]   ;;  %v2080_v46 = vld.sshfl [vmem:[%s683_s14] sm:$0x11 pattern:$0x75316420] }
  0xa5   : > { %1245 = vmatpush1.bf16.msra.mxu0 %v2305_v47  ;;  %v1036_v47 = vcombine.high %v2080_v46, %v2080_v46 }
  0xa6   : > { %1003 = vmatpush1.bf16.msra.mxu1 %v2281_v27  ;;  %1246 = vmatprep.subr.bf16.mxu0 %v2310_v48  ;;  %v2323_v27 = vld [vmem:[%s2888_s24 + $0xb0] ss:$8 sps:$4 sm:$0xff]   ;;  %v1043_v48 = vrot.slane %v2080_v46, %v2963_v56 }
  0xa7   : > { %1004 = vmatprep.subr.bf16.mxu1 %v2282_v28  ;;  %v1099_v28 = vld [vmem:[%s2888_s24 + $0xc0] sm:$0xff]  ;;  %s3200_s24 = sld [smem:[#allocation23_spill]] }
  0xa8   : > { %v1052_v50 = vpack.i.b16 %v1043_v48, %v1043_v48 }
  0xa9   : > { %1247 = vmatpush1.bf16.msra.mxu0 %v2308_v49  ;;  %v1050_v49 = vrot.slane %v1036_v47, %v2963_v56 }
  0xaa   : > { %1005 = vmatpush1.bf16.msra.mxu1 %v2284_v29  ;;  %1248 = vmatprep.subr.bf16.mxu0 %v2313_v18  ;;  %v2106_v29 = vcombine.high %v1099_v28, %v1099_v28  ;;  %v1057_v52 = vrot.slane %v1052_v50, %v2967_v61  ;;  %v2361_v18 = vld [vmem:[%s2987_s12 + $0xb0] ss:$8 sps:$4 sm:$0xff]  }
  0xab   : > { %1006 = vmatprep.subr.bf16.mxu1 %v2285_v30  ;;  %v2105_v30 = vcombine.low %v1099_v28, %v1099_v28  ;;  %v1059_v51 = vpack.i.b16 %v1050_v49, %v1050_v49  ;;  %v2371_v28 = vld [vmem:[%s2926_s19 + $0x28] sm:$0xff]  }
  0xad   : > { %1249 = vmatpush1.bf16.msra.mxu0 %v2311_v19  ;;  %v1229_v31 = vsel %vm726_vm0, %v2105_v30, 0  ;;  %v1064_v54 = vrot.slane %v1059_v51, %v2967_v61  ;;  %v1349_v19 = vld [vmem:[%s2987_s12 + $0xc0] sm:$0xff] }
  0xae   : > { %1007 = vmatpush1.bf16.msra.mxu1 %v2287_v32  ;;  %1250 = vmatprep.subr.bf16.mxu0 %v2316_v20  ;;  %v2328_v32 = vld [vmem:[%s2987_s12] ss:$8 sps:$4 sm:$0xff]   ;;  %v2135_v20 = vcombine.high %v1349_v19, %v1349_v19 }
  0xaf   : > { %2078 = vmatprep.subr.msk.bf16.mxu1 %vm726_vm0, %v2077_v33  ;;  %v2330_v33 = vld [vmem:[%s2987_s12 + $0x4] ss:$8 sps:$4 sm:$0xff]   ;;  %v2109_v30 = vld.sshfl [vmem:[%s687_s20] sm:$0x11 pattern:$0x75316420] }
  0xb0   : > { %s2157_s20 = sshll.u32 %s2573_s28, 7  ;;  %s2592_s28 = smov [#allocation8]  }
  0xb1   : > { %1251 = vmatpush1.bf16.msra.mxu0 %v2314_v21  ;;  %v2134_v21 = vcombine.low %v1349_v19, %v1349_v19 }
  0xb2   : > { %1009 = vmatpush1.bf16.msra.mxu1 %v979_v35  ;;  %1252 = vmatprep.subr.bf16.mxu0 %v2319_v22  ;;  %v2331_v35 = vld [vmem:[%s2987_s12 + $0x10] ss:$8 sps:$4 sm:$0xff]  }
  0xb3   : > { %1484 = vmatprep.subr.bf16.mxu1 %v2330_v33  ;;  %v1479_v22 = vsel %vm726_vm0, %v2134_v21, 0 }
  0xb5   : > { %1253 = vmatpush1.bf16.msra.mxu0 %v2317_v23  ;;  %v2366_v23 = vld [vmem:[%s2926_s19] sm:$0xff]  }
  0xb6   : > { %1254 = vmatprep.subr.bf16.mxu0 %v2322_v24  ;;  %v2367_v24 = vld [vmem:[%s2926_s19 + $0x8] sm:$0xff]  }
  0xb9   : > { %1255 = vmatpush1.bf16.msra.mxu0 %v2320_v25  ;;  %v2368_v25 = vld [vmem:[%s2926_s19 + $0x10] sm:$0xff]  }
  0xba   : > { %1256 = vmatprep.subr.bf16.mxu0 %v2325_v26  ;;  %v2369_v26 = vld [vmem:[%s2926_s19 + $0x18] sm:$0xff]  }
  0xbd   : > { %1257 = vmatpush1.bf16.msra.mxu0 %v2323_v27  ;;  %v2370_v27 = vld [vmem:[%s2926_s19 + $0x20] sm:$0xff]  }
  0xbe   : > { %2107 = vmatprep.subr.msk.bf16.mxu0 %vm726_vm0, %v2106_v29  ;;  %v2372_v29 = vld [vmem:[%s2926_s19 + $0x30] sm:$0xff]  }
  0xc1   : > { %1259 = vmatpush1.bf16.msra.mxu0 %v1229_v31  ;;  %v1286_v31 = vcombine.high %v2109_v30, %v2109_v30 }
  0xc2   : > { %1688 = vmatprep.subr.bf16.mxu0 %v2588_v0 }
  0xc3   : > { %v1300_v33 = vrot.slane %v1286_v31, %v2963_v56 }
 0x163   : > { %v767_v1 = vpop.f32.mrb[0].mxu0 }
 0x164   : > { %v774_v3 = vpack.c.bf16 %v767_v1, %v767_v1  ;;  %v769_v4 = vpop.f32.mrb[1].mxu0 }
 0x165   : > { %v775_v5 = vpack.c.bf16 %v769_v4, %v769_v4  ;;  %v771_v6 = vpop.f32.mrb[2].mxu0 }
 0x166   : > { %v814_v7 = vadd.bf16 %v806_v63, %v774_v3  ;;  %v772_v8 = vpop.f32.mrb[3].mxu0 }
 0x167   : > { %v815_v9 = vadd.bf16 %v813_v2, %v775_v5 }
 0x168   : > { %v816_v10 = vmul.bf16 1056980736, %v814_v7 }
 0x169   : > { %v817_v11 = vmul.bf16 1056980736, %v815_v9  ;;  %v2351_v9 = vld [vmem:[%s2987_s12 + $0x74] ss:$8 sps:$4 sm:$0xff]  }
 0x16a   : > { %2379 = vtanh.bf16 %v816_v10 }
 0x16b   : > { %2381 = vtanh.bf16 %v817_v11 }
 0x175   : > { %v2380_v12 = vpop.eup %2379 }
 0x176   : > { %v2382_v13 = vpop.eup %2381  ;;  %v820_v14 = vadd.bf16 1065369472, %v2380_v12  ;;  %v2352_v12 = vld [vmem:[%s2987_s12 + $0x80] ss:$8 sps:$4 sm:$0xff]  }
 0x177   : > { %v821_v15 = vadd.bf16 1065369472, %v2382_v13  ;;  %v2357_v13 = vld [vmem:[%s2987_s12 + $0x94] ss:$8 sps:$4 sm:$0xff]  }
 0x178   : > { %v822_v17 = vmul.bf16 %v820_v14, %v816_v10  ;;  %v2349_v10 = vld [vmem:[%s2987_s12 + $0x70] ss:$8 sps:$4 sm:$0xff]  }
 0x179   : > { %v823_v16 = vmul.bf16 %v821_v15, %v817_v11  ;;  %v2354_v11 = vld [vmem:[%s2987_s12 + $0x84] ss:$8 sps:$4 sm:$0xff]   ;;  %v2355_v14 = vld [vmem:[%s2987_s12 + $0x90] ss:$8 sps:$4 sm:$0xff]  }
 0x17a   : > { %v2360_v15 = vld [vmem:[%s2987_s12 + $0xa4] ss:$8 sps:$4 sm:$0xff]  }
 0x17b   : > { %2079 = vmatprep.mubr.msk.bf16.mxu1 %vm974_vm2, %v823_v16  ;;  %v2358_v16 = vld [vmem:[%s2987_s12 + $0xa0] ss:$8 sps:$4 sm:$0xff]  }
 0x17c   : > { %1017 = vmatmul.mubr.bf16.vlgmr.msra.gmra.mrb[0].mxu1 %v822_v17  ;;  %v2363_v17 = vld [vmem:[%s2987_s12 + $0xb4] ss:$8 sps:$4 sm:$0xff]  }
 0x17d   : > { %1485 = vmatpush1.bf16.msra.mxu1 %v2328_v32  ;;  %v1293_v32 = vrot.slane %v2109_v30, %v2963_v56 }
 0x17e   : > { %1486 = vmatprep.subr.bf16.mxu1 %v2333_v34 }
 0x17f   : > { %v1302_v34 = vpack.i.b16 %v1293_v32, %v1293_v32 }
 0x181   : > { %1487 = vmatpush1.bf16.msra.mxu1 %v2331_v35  ;;  %v1309_v35 = vpack.i.b16 %v1300_v33, %v1300_v33 }
 0x182   : > { %1488 = vmatprep.subr.bf16.mxu1 %v2336_v36  ;;  %v1307_v36 = vrot.slane %v1302_v34, %v2967_v61 }
 0x185   : > { %1489 = vmatpush1.bf16.msra.mxu1 %v2334_v37 }
 0x186   : > { %1490 = vmatprep.subr.bf16.mxu1 %v2339_v38  ;;  %v1314_v38 = vrot.slane %v1309_v35, %v2967_v61 }
 0x189   : > { %1491 = vmatpush1.bf16.msra.mxu1 %v2337_v39 }
 0x18a   : > { %1492 = vmatprep.subr.bf16.mxu1 %v2342_v40 }
 0x18d   : > { %1493 = vmatpush1.bf16.msra.mxu1 %v2340_v41 }
 0x18e   : > { %1494 = vmatprep.subr.bf16.mxu1 %v2345_v42 }
 0x191   : > { %1495 = vmatpush1.bf16.msra.mxu1 %v2343_v43 }
 0x192   : > { %1496 = vmatprep.subr.bf16.mxu1 %v2348_v44 }
 0x195   : > { %1497 = vmatpush1.bf16.msra.mxu1 %v2346_v45 }
 0x196   : > { %1498 = vmatprep.subr.bf16.mxu1 %v2351_v9 }
 0x199   : > { %1499 = vmatpush1.bf16.msra.mxu1 %v2349_v10 }
 0x19a   : > { %1500 = vmatprep.subr.bf16.mxu1 %v2354_v11 }
 0x19d   : > { %1501 = vmatpush1.bf16.msra.mxu1 %v2352_v12 }
 0x19e   : > { %1502 = vmatprep.subr.bf16.mxu1 %v2357_v13 }
 0x1a1   : > { %1503 = vmatpush1.bf16.msra.mxu1 %v2355_v14 }
 0x1a2   : > { %1504 = vmatprep.subr.bf16.mxu1 %v2360_v15 }
 0x1a5   : > { %1505 = vmatpush1.bf16.msra.mxu1 %v2358_v16 }
 0x1a6   : > { %1506 = vmatprep.subr.bf16.mxu1 %v2363_v17 }
 0x1a9   : > { %1507 = vmatpush1.bf16.msra.mxu1 %v2361_v18 }
 0x1aa   : > { %2136 = vmatprep.subr.msk.bf16.mxu1 %vm726_vm0, %v2135_v20 }
 0x1ad   : > { %1509 = vmatpush1.bf16.msra.mxu1 %v1479_v22 }
 0x24f   : > { %v1018_v53 = vpop.f32.mrb[0].mxu1 }
 0x250   : > { %v1025_v55 = vpack.c.bf16 %v1018_v53, %v1018_v53  ;;  %v1020_v57 = vpop.f32.mrb[1].mxu1 }
 0x251   : > { %v1026_v58 = vpack.c.bf16 %v1020_v57, %v1020_v57  ;;  %v1022_v59 = vpop.f32.mrb[2].mxu1  ;;  %v2375_v57 = vld [vmem:[%s2926_s19 + $0x48] sm:$0xff]  }
 0x252   : > { %v1065_v60 = vadd.bf16 %v1057_v52, %v1025_v55  ;;  %v1023_v62 = vpop.f32.mrb[3].mxu1  ;;  %v2374_v55 = vld [vmem:[%s2926_s19 + $0x40] sm:$0xff]   ;;  %v2377_v59 = vld [vmem:[%s2926_s19 + $0x58] sm:$0xff]  }
 0x253   : > { %v1066_v63 = vadd.bf16 %v1064_v54, %v1026_v58  ;;  %v2373_v54 = vld [vmem:[%s2926_s19 + $0x38] sm:$0xff]   ;;  %v2376_v58 = vld [vmem:[%s2926_s19 + $0x50] sm:$0xff]  }
 0x254   : > { %v1067_v1 = vmul.bf16 1056980736, %v1065_v60  ;;  %v2378_v60 = vld [vmem:[%s2926_s19 + $0x60] ss:$0 sps:$4 sm:$0xff]   ;;  %s3199_s19 = sld [smem:[#allocation22_spill]] }
 0x255   : > { %v1068_v2 = vmul.bf16 1056980736, %v1066_v63  ;;  %v1686_v62 = vsel %vm726_vm0, %v2378_v60, 0 }
 0x256   : > { %2383 = vtanh.bf16 %v1067_v1  ;;  %v2138_v63 = vld.sshfl [vmem:[%s691_s6] sm:$0x11 pattern:$0x75316420]  ;;  %s3203_s6 = sld [smem:[#allocation25_spill]] }
 0x257   : > { %2385 = vtanh.bf16 %v1068_v2 }
 0x25a   : > { %s699_s17 = scalar_lea.vmem %s3199_s19, %s2897_s8  ;;  %s2495_s19 = scalar_lea.vmem %s3090_s16, 128 }
 0x25b   : > { %p2496_p10 = scmp.ne.s32.totalorder %s3090_s16, %s2495_s19 }
 0x25c   : > { %s3088_s5 = scalar_lea.hbm %s3203_s6, %s2157_s20 }
 0x25d   : > { %p2497_p9 = pnand %p2496_p10, %p3204_p8 }
 0x25f   : > { %p2498_p12 = pneg %p2497_p9 }
 0x261   : > { %v2384_v3 = vpop.eup %2383 }
 0x262   : > { %v2386_v4 = vpop.eup %2385  ;;  %v1071_v5 = vadd.bf16 1065369472, %v2384_v3 }
 0x263   : > { %v1072_v6 = vadd.bf16 1065369472, %v2386_v4 }
 0x264   : > { %v1073_v8 = vmul.bf16 %v1071_v5, %v1067_v1  ;;  %v1536_v1 = vcombine.high %v2138_v63, %v2138_v63 }
 0x265   : > { %v1074_v7 = vmul.bf16 %v1072_v6, %v1068_v2  ;;  %v1543_v2 = vrot.slane %v2138_v63, %v2963_v56 }
 0x266   : > { %v1550_v3 = vrot.slane %v1536_v1, %v2963_v56 }
 0x267   : > { %2108 = vmatprep.mubr.msk.bf16.mxu0 %vm974_vm2, %v1074_v7  ;;  %v1552_v4 = vpack.i.b16 %v1543_v2, %v1543_v2 }
 0x268   : > { %1267 = vmatmul.mubr.bf16.vlgmr.msra.gmra.mrb[4].mxu0 %v1073_v8  ;;  %v1559_v5 = vpack.i.b16 %v1550_v3, %v1550_v3 }
 0x269   : > { %1689 = vmatpush1.bf16.msra.mxu0 %v2366_v23  ;;  %v1557_v6 = vrot.slane %v1552_v4, %v2967_v61 }
 0x26a   : > { %1690 = vmatprep.subr.bf16.mxu0 %v2588_v0 }
 0x26d   : > { %1691 = vmatpush1.bf16.msra.mxu0 %v2367_v24 }
 0x26e   : > { %1692 = vmatprep.subr.bf16.mxu0 %v2588_v0 }
 0x271   : > { %1693 = vmatpush1.bf16.msra.mxu0 %v2368_v25 }
 0x272   : > { %1694 = vmatprep.subr.bf16.mxu0 %v2588_v0 }
 0x275   : > { %1695 = vmatpush1.bf16.msra.mxu0 %v2369_v26 }
 0x276   : > { %1696 = vmatprep.subr.bf16.mxu0 %v2588_v0 }
 0x279   : > { %1697 = vmatpush1.bf16.msra.mxu0 %v2370_v27  ;;  %v2154_v27 = vld [vmem:[%s3200_s24] ss:$0 sm:$0xff] }
 0x27a   : > { %1698 = vmatprep.subr.bf16.mxu0 %v2588_v0 }
 0x27d   : > { %1699 = vmatpush1.bf16.msra.mxu0 %v2371_v28 }
 0x27e   : > { %1700 = vmatprep.subr.bf16.mxu0 %v2588_v0 }
 0x281   : > { %1701 = vmatpush1.bf16.msra.mxu0 %v2372_v29 }
 0x282   : > { %1702 = vmatprep.subr.bf16.mxu0 %v2588_v0 }
 0x285   : > { %1703 = vmatpush1.bf16.msra.mxu0 %v2373_v54 }
 0x286   : > { %1704 = vmatprep.subr.bf16.mxu0 %v2588_v0 }
 0x289   : > { %1705 = vmatpush1.bf16.msra.mxu0 %v2374_v55 }
 0x28a   : > { %1706 = vmatprep.subr.bf16.mxu0 %v2588_v0 }
 0x28d   : > { %1707 = vmatpush1.bf16.msra.mxu0 %v2375_v57 }
 0x28e   : > { %1708 = vmatprep.subr.bf16.mxu0 %v2588_v0 }
 0x291   : > { %1709 = vmatpush1.bf16.msra.mxu0 %v2376_v58 }
 0x292   : > { %1710 = vmatprep.subr.bf16.mxu0 %v2588_v0 }
 0x295   : > { %1711 = vmatpush1.bf16.msra.mxu0 %v2377_v59 }
 0x296   : > { %1712 = vmatprep.subr.bf16.mxu0 %v2588_v0  ;;  %v1564_v0 = vrot.slane %v1559_v5, %v2967_v61  ;;  %v2139_v61 = vld [vmem:[%s699_s17] ss:$0 sm:$0xff]  ;;  %s2499_s17 = sshll.u32 %s2592_s28, 4  ;;  %s2500_s17 = int_to_ptr.vmem [resolvable:$false] %s2499_s17 }
 0x297   : > { %s2501_s25 = scalar_lea.vmem %s2500_s17, 256  ;;  %p2502_p1 = scmp.lt.s32.totalorder %s3090_s16, %s2500_s17 }
 0x298   : > { %p2503_p6 = scmp.lt.s32.totalorder %s2501_s25, %s2495_s19 }
 0x299   : > { %1713 = vmatpush1.bf16.msra.mxu0 %v1686_v62 }
 0x29a   : > { %p2504_p13 = por %p2503_p6, %p2502_p1 }
 0x29c   : > { %p2505_p11 = pnand %p2504_p13, %p2498_p12 }
 0x33b   : > { %v1268_v37 = vpop.f32.mrb[4].mxu0 }
 0x33c   : > { %v1275_v39 = vpack.c.bf16 %v1268_v37, %v1268_v37  ;;  %v1270_v40 = vpop.f32.mrb[5].mxu0 }
 0x33d   : > { %v1276_v41 = vpack.c.bf16 %v1270_v40, %v1270_v40  ;;  %v1272_v42 = vpop.f32.mrb[6].mxu0 }
 0x33e   : > { %v1315_v43 = vadd.bf16 %v1307_v36, %v1275_v39  ;;  %v1273_v44 = vpop.f32.mrb[7].mxu0 }
 0x33f   : > { %v1316_v45 = vadd.bf16 %v1314_v38, %v1276_v41  ;;  %v2155_v44 = vld [vmem:[%s3201_s10] ss:$0 sm:$0xff] }
 0x340   : > { %v1317_v46 = vmul.bf16 1056980736, %v1315_v43 }
 0x341   : > { %v1318_v47 = vmul.bf16 1056980736, %v1316_v45 }
 0x342   : > { %2387 = vtanh.bf16 %v1317_v46 }
 0x343   : > { %2389 = vtanh.bf16 %v1318_v47 }
 0x34d   : > { %v2388_v48 = vpop.eup %2387 }
 0x34e   : > { %v2390_v49 = vpop.eup %2389  ;;  %v1321_v50 = vadd.bf16 1065369472, %v2388_v48 }
 0x34f   : > { %v1322_v51 = vadd.bf16 1065369472, %v2390_v49 }
 0x350   : > { %v1323_v53 = vmul.bf16 %v1321_v50, %v1317_v46 }
 0x351   : > { %v1324_v52 = vmul.bf16 %v1322_v51, %v1318_v47 }
 0x353   : > { %2137 = vmatprep.mubr.msk.bf16.mxu1 %vm974_vm2, %v1324_v52 }
 0x354   : > { %1517 = vmatmul.mubr.bf16.vlgmr.msra.gmra.mrb[4].mxu1 %v1323_v53 }
 0x427   : > { %v1518_v7 = vpop.f32.mrb[4].mxu1 }
 0x428   : > { %v1525_v8 = vpack.c.bf16 %v1518_v7, %v1518_v7  ;;  %v1520_v9 = vpop.f32.mrb[5].mxu1 }
 0x429   : > { %v1526_v10 = vpack.c.bf16 %v1520_v9, %v1520_v9  ;;  %v1522_v11 = vpop.f32.mrb[6].mxu1 }
 0x42a   : > { %v1565_v12 = vadd.bf16 %v1557_v6, %v1525_v8  ;;  %v1523_v13 = vpop.f32.mrb[7].mxu1 }
 0x42b   : > { %v1566_v14 = vadd.bf16 %v1564_v0, %v1526_v10 }
 0x42c   : > { %v1567_v15 = vmul.bf16 1056980736, %v1565_v12 }
 0x42d   : > { %v1568_v16 = vmul.bf16 1056980736, %v1566_v14 }
 0x42e   : > { %2391 = vtanh.bf16 %v1567_v15 }
 0x42f   : > { %2393 = vtanh.bf16 %v1568_v16 }
 0x439   : > { %v2392_v56 = vpop.eup %2391 }
 0x43a   : > { %v2394_v17 = vpop.eup %2393  ;;  %v1571_v18 = vadd.bf16 1065369472, %v2392_v56 }
 0x43b   : > { %v1572_v19 = vadd.bf16 1065369472, %v2394_v17 }
 0x43c   : > { %v1573_v21 = vmul.bf16 %v1571_v18, %v1567_v15 }
 0x43d   : > { %v1574_v20 = vmul.bf16 %v1572_v19, %v1568_v16 }
 0x43f   : > { %2153 = vmatprep.mubr.msk.bf16.mxu0 %vm974_vm2, %v1574_v20 }
 0x440   : > { %1721 = vmatmul.mubr.bf16.vlgmr.msra.gmra.mrb[8].mxu0 %v1573_v21 }
 0x513   : > { %v1722_v22 = vpop.f32.mrb[8].mxu0 }
 0x514   : > { %v1723_v23 = vadd.f32 %v2139_v61, %v1722_v22  ;;  %v1724_v24 = vpop.f32.mrb[9].mxu0 }
 0x515   : > { %v1725_v25 = vpop.f32.mrb[10].mxu0 }
 0x516   : > { %v1726_v26 = vpop.f32.mrb[11].mxu0  ;;  %1737 = vrot.lane.b32.xlu0 %v1723_v23, %s2590_s22  ;;  %1787 = vst.msk [vmem:[%s3074_s18] sm:$0xff] %vm1786_vm3, %v1723_v23 }
 0x588   : > { %v1738_v28 = vpop.permute.xlu0 %1737 }
 0x589   : > { %v1740_v29 = vsub.f32 %v2154_v27, %v1738_v28 }
 0x58b   : > { %v1744_v30 = vand.u32 2147483647, %v1740_v29  ;;  %v1741_v41 = vmax.f32 %v1740_v29, 0.0  ;;  %vm1742_vm5 = vcmp.ne.f32.partialorder %v1740_v29, %v1740_v29 }
 0x58d   : > { %v1745_v31 = vsub.f32 0.0, %v1744_v30 }
 0x58f   : > { %v1746_v32 = vmul.f32 1.442695, %v1745_v31 }
 0x591   : > { %2395 = vpow2.f32 %v1746_v32 }
 0x59b   : > { %v2396_v33 = vpop.eup %2395 }
 0x59c   : > { %v1748_v34 = vadd.f32 1.0, %v2396_v33  ;;  %v1751_v35 = vmul.f32 -0.5, %v2396_v33  ;;  %v1754_v37 = vand.u32 2147483647, %v2396_v33 }
 0x59e   : > { %2397 = vlog2.f32 %v1748_v34  ;;  %v1752_v36 = vadd.f32 1.0, %v1751_v35  ;;  %vm1755_vm4 = vcmp.lt.f32.partialorder %v1754_v37, 0.0004427343 }
 0x5a0   : > { %v1753_v40 = vmul.f32 %v2396_v33, %v1752_v36 }
 0x5a8   : > { %v2398_v38 = vpop.eup %2397 }
 0x5a9   : > { %v1750_v39 = vmul.f32 0.6931472, %v2398_v38 }
 0x5ab   : > { %v1756_v42 = vsel %vm1755_vm4, %v1753_v40, %v1750_v39 }
 0x5ac   : > { %v1757_v43 = vadd.f32 %v1756_v42, %v1741_v41 }
 0x5ae   : > { %v1758_v45 = vsel %vm1742_vm5, %v1740_v29, %v1757_v43 }
 0x5af   : > { %v1759_v46 = vsub.f32 %v2154_v27, %v1758_v45 }
 0x5b1   : > { %v1766_v47 = vsub.f32 %v1759_v46, %v2155_v44 }
 0x5b3   : > { %v1770_v48 = vand.u32 2147483647, %v1766_v47  ;;  %v1767_v60 = vmax.f32 %v1766_v47, 0.0  ;;  %vm1768_vm7 = vcmp.ne.f32.partialorder %v1766_v47, %v1766_v47 }
 0x5b5   : > { %v1771_v49 = vsub.f32 0.0, %v1770_v48 }
 0x5b7   : > { %v1772_v50 = vmul.f32 1.442695, %v1771_v49 }
 0x5b9   : > { %2399 = vpow2.f32 %v1772_v50 }
 0x5c3   : > { %v2400_v51 = vpop.eup %2399 }
 0x5c4   : > { %v1774_v52 = vadd.f32 1.0, %v2400_v51  ;;  %v1777_v53 = vmul.f32 -0.5, %v2400_v51  ;;  %v1780_v55 = vand.u32 2147483647, %v2400_v51 }
 0x5c6   : > { %2401 = vlog2.f32 %v1774_v52  ;;  %v1778_v54 = vadd.f32 1.0, %v1777_v53  ;;  %vm1781_vm6 = vcmp.lt.f32.partialorder %v1780_v55, 0.0004427343 }
 0x5c8   : > { %v1779_v59 = vmul.f32 %v2400_v51, %v1778_v54 }
 0x5d0   : > { %v2402_v57 = vpop.eup %2401 }
 0x5d1   : > { %v1776_v58 = vmul.f32 0.6931472, %v2402_v57 }
 0x5d3   : > { %v1782_v62 = vsel %vm1781_vm6, %v1779_v59, %v1776_v58 }
 0x5d4   : > { %v1783_v63 = vadd.f32 %v1782_v62, %v1767_v60 }
 0x5d6   : > { %v1784_v1 = vsel %vm1768_vm7, %v1766_v47, %v1783_v63 }
 0x5d7   : > { %v1785_v2 = vadd.f32 %v2155_v44, %v1784_v1 }
 0x5d9   : > { %v1788_v3 = vmul.f32 1.442695, %v1785_v2 }
 0x5db   : > { %2403 = vpow2.f32 %v1788_v3 }
 0x5e5   : > { %v2404_v4 = vpop.eup %2403 }
 0x5e6   : > { %1791 = vrot.lane.b32.xlu0 %v2404_v4, %s2591_s11 }
 0x658   : > { %v1792_v5 = vpop.permute.xlu0 %1791 }
 0x659   : > { %1795 = vst.msk [vmem:[%s3074_s18] sm:$0xff] %vm1794_vm8, %v1792_v5 }
 0x65a   : > { %2508 = shalt.err (!%p2505_p11)
}
 0x65b   : > { %s2509_s21 = scalar_lea.hbm %s3088_s5, 128  ;;  %s2513_s12 = scalar_lea.hbm %s3203_s6, 256 }
 0x65c   : > { %p2510_p2 = scmp.ne.s32.totalorder %s3088_s5, %s2509_s21  ;;  %p2514_p4 = scmp.lt.u32.totalorder %s3088_s5, %s3203_s6 }
 0x65d   : > { %p2515_p3 = scmp.lt.u32.totalorder %s2513_s12, %s2509_s21  ;;  %p2517_p10 = scmp.lt.u32.totalorder %s2509_s21, %s3088_s5 }
 0x65e   : > { %p2511_p5 = pnand %p2510_p2, %p3204_p8 }
 0x65f   : > { %p2516_p0 = por %p2515_p3, %p2514_p4 }
 0x660   : > { %p2512_p7 = pneg %p2511_p5 }
 0x661   : > { %p2518_p9 = por %p2517_p10, %p2516_p0 }
 0x663   : > { %p2519_p12 = pnand %p2518_p9, %p2512_p7 }
 0x665   : > { %2522 = shalt.err (!%p2519_p12)
}
 0x666   : > { %2175 = dma.vmem_to_hbm [thread:$0]  (%p3204_p8), %s3090_s16, 128, %s3088_s5, %s1797_s30  }
 0x667 PF: > { %s3205_s8 = sld [smem:[#allocation12_spill]]  ;;  %s3206_s14 = sld [smem:[#allocation18_spill]] }
 0x668   : > { %s3207_s10 = sld [smem:[#allocation14_spill]] }
 0x66d   : > { %s1823_s11 = sand.u32 1, %s3205_s8   ;;  %p3208_p1 = scmp.ne.s32.totalorder %s3206_s14, 0 }
 0x66e   : > { %p3209_p6 = scmp.ge.s32.totalorder %s3207_s10, 2  ;;  %s1824_s20 = scalar_lea.sflag [#allocation4], %s1823_s11 }
 0x670   : > { %p2188_p13 = pnand %p3209_p6, %p3208_p1 }
 0x672   : > { %2556 = dma.done.wait (!%p2188_p13), %s1824_s20, 128  }
 0x673   : > { %2558 = vsyncadd (!%p2188_p13), %s1824_s20, 4294967168  ;;  %s32_s30 = sadd.s32 1, %s3207_s10   ;;  %s3210_s15 = sld [smem:[#allocation17_spill]] }
 0x674   : > { %p29_p11 = scmp.ge.s32.totalorder %s32_s30, 4   ;;  %s3211_s28 = sld [smem:[#allocation13_spill]] }
 0x675   : > { %s3212_s29 = sld [smem:[#allocation15_spill]]  ;;  %s3213_s25 = smov %s2565_s26 }
 0x676   : > { %s3214_s26 = smov %s2569_s27  ;;  %31 = sbr.rel (!%p29_p11) target bundleno = 16 (0x10), region = 165 }
 0x679   : > { %s3215_s27 = smov %s3210_s15 }
 0x67d   :  { %1829 = vsyncpa [#allocation3], 1 }
 0x67e   :  { %1831 = vsyncpa [#allocation3 + $0x1], 1 }
 0x67f   :  { %1832 = vsyncpa [#allocation6], 1 }
 0x680   :  { %1834 = vsyncpa [#allocation6 + $0x1], 1 }
 0x681   :  { %1835 = vsyncpa [#allocation4], 1 }
 0x682   :  { %1837 = vsyncpa [#allocation4 + $0x1], 1 }

</bundles_post_ra>
